<compile_context>
chip_gen: v5e
topology: v5e:2x2
jax: 0.10.0
libtpu: 0.0.40
codegen_flags: <defaults>
</compile_context>

<pallas_src>
import jax
import jax.numpy as jnp
from jax import lax
from jax.experimental import pallas as pl
from jax.experimental.pallas import tpu as pltpu


# ----------------------------------------------------------------------------------
# 1) Module-equivalent kernel: scalars in, scalar out (exact semantics of forward()).
# ----------------------------------------------------------------------------------
def _awl_kernel(p_ref, l_ref, out_ref):
    # p_ref, l_ref: (1, NUM) f32 in VMEM; out_ref: (1, 1) f32 in SMEM.
    p = p_ref[...]
    l = l_ref[...]
    p2 = p * p
    weighted = 0.5 * l / p2            # exact division (review: approx buys nothing here)
    reg = jnp.log(1.0 + p2)            # log(1+x): guaranteed Mosaic lowering; params ~1
    out_ref[0, 0] = jnp.sum(weighted + reg)


def _awl_forward(params_row, loss_row):
    num = params_row.shape[-1]
    ce = pl.CostEstimate(flops=8 * num, transcendentals=num,
                         bytes_accessed=4 * (2 * num + 1))
    out = pl.pallas_call(
        _awl_kernel,
        out_shape=jax.ShapeDtypeStruct((1, 1), jnp.float32),
        in_specs=[pl.BlockSpec(memory_space=pltpu.MemorySpace.VMEM),
                  pl.BlockSpec(memory_space=pltpu.MemorySpace.VMEM)],
        out_specs=pl.BlockSpec(memory_space=pltpu.MemorySpace.SMEM),
        cost_estimate=ce,
    )(params_row, loss_row)
    return out[0, 0]


@jax.custom_vjp
def _awl_call(params, loss_vec):
    return _awl_forward(params.reshape(1, -1), loss_vec.reshape(1, -1))


def _awl_vjp_fwd(params, loss_vec):
    out = _awl_forward(params.reshape(1, -1), loss_vec.reshape(1, -1))
    return out, (params, loss_vec)


def _awl_vjp_bwd(res, g):
    p, l = res
    p2 = p * p
    dp = g * (-l / (p2 * p) + 2.0 * p / (1.0 + p2))
    dl = g * (0.5 / p2)
    return dp, dl


_awl_call.defvjp(_awl_vjp_fwd, _awl_vjp_bwd)


def automatic_weighted_loss(params, *losses):
    """Module-equivalent forward. params: (NUM,) f32; losses: NUM scalar losses."""
    num = params.shape[0]
    assert len(losses) == num
    loss_vec = jnp.stack([jnp.asarray(l, jnp.float32).reshape(()) for l in losses])
    return _awl_call(params.astype(jnp.float32), loss_vec)


# ----------------------------------------------------------------------------------
# 2) Fused version: amortize launch cost by doing the upstream mean-reductions inside.
#    Takes per-element loss tensors, computes loss_i = mean(elems_i) with a tiled,
#    lane-dense grid, then applies the AWL combination in the last grid step.
# ----------------------------------------------------------------------------------
_LANES = 128              # lane-dense last dim (raise to a larger multiple of 128 for big tensors)
_MAX_ROWS_PER_TILE = 512  # 512x128 f32 = 256 KiB/block -> fits v5e/v6e/v7x VMEM budgets


def _awl_fused_kernel(params_ref, counts_ref, x_ref, out_ref, sums_ref):
    t = pl.program_id(0)   # task axis
    r = pl.program_id(1)   # row-tile (reduction) axis — last, "arbitrary"

    @pl.when(jnp.logical_and(t == 0, r == 0))
    def _init():
        sums_ref[...] = jnp.zeros_like(sums_ref)

    # Upcast at load (v5e has no bf16 VPU path); zero padding contributes 0 to the sum.
    tile_sum = jnp.sum(x_ref[...].astype(jnp.float32))
    onehot = (lax.broadcasted_iota(jnp.int32, sums_ref.shape, 1) == t).astype(jnp.float32)
    sums_ref[...] = sums_ref[...] + tile_sum * onehot

    @pl.when(jnp.logical_and(t == pl.num_programs(0) - 1,
                             r == pl.num_programs(1) - 1))
    def _finalize():
        p = params_ref[...]                       # (1, NUM)
        means = sums_ref[...] / counts_ref[...]   # per-task mean loss
        p2 = p * p
        out_ref[0, 0] = jnp.sum(0.5 * means / p2 + jnp.log(1.0 + p2))


def automatic_weighted_loss_fused(params, *elementwise_losses):
    """Fused forward: elementwise_losses[i] is the full per-element loss tensor for
    task i; the kernel computes mean(elementwise_losses[i]) and the AWL combination
    in one pallas_call (equivalent to awl(*[mean(e) for e in elementwise_losses]))."""
    num = params.shape[0]
    assert len(elementwise_losses) == num

    flats, counts = [], []
    for x in elementwise_losses:
        f = jnp.asarray(x, jnp.float32).reshape(-1)
        counts.append(f.size)
        flats.append(f)

    # Lane-dense layout: pad each task's flattened data to a common (rows, _LANES).
    rows = max(-(-n // _LANES) for n in counts)
    rows = max(8, -(-rows // 8) * 8)                   # sublane multiple of 8
    tile_rows = min(rows, _MAX_ROWS_PER_TILE)
    rows = -(-rows // tile_rows) * tile_rows           # rows multiple of tile_rows
    padded = [jnp.pad(f, (0, rows * _LANES - f.size)).reshape(rows, _LANES)
              for f in flats]
    data = jnp.stack(padded)                           # (NUM, rows, _LANES)
    # TODO(synk): for production, pass each task's tensor as its own pl.ANY input and
    # DMA tiles directly from HBM instead of materializing this padded stack.

    params_row = params.astype(jnp.float32).reshape(1, num)
    counts_row = jnp.asarray(counts, jnp.float32).reshape(1, num)

    grid = (num, rows // tile_rows)
    total_elems = num * rows * _LANES
    ce = pl.CostEstimate(flops=total_elems + 8 * num, transcendentals=num,
                         bytes_accessed=4 * total_elems)

    out = pl.pallas_call(
        _awl_fused_kernel,
        out_shape=jax.ShapeDtypeStruct((1, 1), jnp.float32),
        grid_spec=pltpu.PrefetchScalarGridSpec(
            num_scalar_prefetch=0,
            grid=grid,
            in_specs=[
                pl.BlockSpec((1, num), lambda t, r: (0, 0)),                    # params
                pl.BlockSpec((1, num), lambda t, r: (0, 0)),                    # counts
                pl.BlockSpec((1, tile_rows, _LANES), lambda t, r: (t, r, 0)),   # data tiles
            ],
            out_specs=pl.BlockSpec((1, 1), lambda t, r: (0, 0),
                                   memory_space=pltpu.MemorySpace.SMEM),
            scratch_shapes=[pltpu.VMEM((1, num), jnp.float32)],                 # per-task sums
        ),
        compiler_params=pltpu.CompilerParams(
            # Both axes carry the running per-task sums / scalar output -> "arbitrary".
            # TODO(synk): for v7x megacore, split the row axis across cores with
            # per-core partial sums and a final combine step.
            dimension_semantics=("arbitrary", "arbitrary")),
        cost_estimate=ce,
    )(params_row, counts_row, data)
    return out[0, 0]


# ----------------------------------------------------------------------------------
# Reference (plain JAX, mirrors the PyTorch module).
# ----------------------------------------------------------------------------------
def _reference(params, *losses):
    total = 0.0
    for i, l in enumerate(losses):
        total = total + 0.5 / params[i] ** 2 * l + jnp.log(1.0 + params[i] ** 2)
    return total


if __name__ == "__main__":
    key = jax.random.PRNGKey(0)
    k1, k2 = jax.random.split(key)

    # Deterministic parameter init, matching torch.ones(num) in __init__.
    params = jnp.ones((2,), jnp.float32)

    # Two small synthetic tasks: per-element losses, then their scalar means.
    e1 = jax.random.normal(k1, (2, 4, 16, 16)) ** 2     # MSE-like per-element loss
    e2 = jnp.abs(jax.random.normal(k2, (2, 8, 32)))     # L1-like per-element loss
    loss1 = jnp.mean(e1)
    loss2 = jnp.mean(e2)

    # --- module-equivalent forward (scalars in, scalar out) ---
    out = jax.block_until_ready(automatic_weighted_loss(params, loss1, loss2))
    ref = _reference(params, loss1, loss2)
    assert jnp.allclose(out, ref, rtol=1e-5, atol=1e-6), (out, ref)

    # --- analytic VJP (params are meant to be learned via gradient descent) ---
    g_kernel = jax.grad(automatic_weighted_loss, argnums=(0, 1, 2))(params, loss1, loss2)
    g_ref = jax.grad(_reference, argnums=(0, 1, 2))(params, loss1, loss2)
    for a, b in zip(g_kernel, g_ref):
        assert jnp.allclose(a, b, rtol=1e-5, atol=1e-6), (a, b)

    # --- fused version: per-task mean reductions + AWL epilogue in one pallas_call ---
    fused = jax.block_until_ready(automatic_weighted_loss_fused(params, e1, e2))
    assert jnp.allclose(fused, ref, rtol=1e-5, atol=1e-6), (fused, ref)

    print("KERNEL_OK")
</pallas_src>

<mosaic_0001>
module attributes {stable_mosaic.version = 11 : i64} {
  func.func @_awl_kernel(%arg0: memref<1x2xf32, #tpu.memory_space<vmem>>, %arg1: memref<1x2xf32, #tpu.memory_space<vmem>>, %arg2: memref<1x1xf32, #tpu.memory_space<smem>>) attributes {dimension_semantics = [], scalar_prefetch = 0 : i64, scratch_operands = 0 : i64, tpu.core_type = #tpu.core_type<tc>} {
    %c0 = arith.constant 0 : index
    %c0_0 = arith.constant 0 : index
    %0 = vector.load %arg0[%c0, %c0_0] : memref<1x2xf32, #tpu.memory_space<vmem>>, vector<1x2xf32>
    %c0_1 = arith.constant 0 : index
    %c0_2 = arith.constant 0 : index
    %1 = vector.load %arg1[%c0_1, %c0_2] : memref<1x2xf32, #tpu.memory_space<vmem>>, vector<1x2xf32>
    %2 = arith.mulf %0, %0 : vector<1x2xf32>
    %cst = arith.constant 5.000000e-01 : f32
    %3 = vector.broadcast %cst : f32 to vector<1x2xf32>
    %4 = arith.mulf %3, %1 : vector<1x2xf32>
    %5 = arith.divf %4, %2 : vector<1x2xf32>
    %cst_3 = arith.constant 1.000000e+00 : f32
    %6 = vector.broadcast %cst_3 : f32 to vector<1x2xf32>
    %7 = arith.addf %6, %2 : vector<1x2xf32>
    %8 = math.log %7 : vector<1x2xf32>
    %9 = arith.addf %5, %8 : vector<1x2xf32>
    %10 = vector.shape_cast %9 : vector<1x2xf32> to vector<1x1x2xf32>
    %cst_4 = arith.constant dense<0.000000e+00> : vector<1xf32>
    %11 = vector.multi_reduction <add>, %10, %cst_4 [1, 2] : vector<1x1x2xf32> to vector<1xf32>
    %12 = vector.shape_cast %11 : vector<1xf32> to vector<1x1x1xf32>
    %13 = vector.extract %12[0, 0, 0] : f32 from vector<1x1x1xf32>
    %c0_5 = arith.constant 0 : index
    %c0_6 = arith.constant 0 : index
    %14 = memref.load %arg2[%c0_5, %c0_6] : memref<1x1xf32, #tpu.memory_space<smem>>
    memref.store %13, %arg2[%c0_5, %c0_6] : memref<1x1xf32, #tpu.memory_space<smem>>
    return
  }
}

</mosaic_0001>

<bundles_post_ra>
// kernel: tpu_custom_call.1
= control target key start
LH: loop header
LB: loop body
LE: loop exit
PB: predicated region body
PF: predicated region fallthrough
CT: control target
= control target key end

     0   :  { %7 = vsyncpa [#allocation3], 0  ;;  %s195_s0 = inlined_call_operand.hbm [shape: f32[1,2], index: 0, kind: input, shape index: {}]   ;;  %s196_s1 = inlined_call_operand.hbm [shape: f32[1,2], index: 1, kind: input, shape index: {}]   ;;  %s197_s2 = inlined_call_operand.hbm [shape: f32[1,1], index: 2, kind: output, shape index: {}]  }
   0x1   :  { %8 = vsyncpa [#allocation6], 0 }
   0x2   :  { %9 = vsyncpa [#allocation4], 0  ;;  %s15_s11 = sshll.u32 %s195_s0, 4  ;;  %s168_s12 = smov [#allocation2]   ;;  %s16_s11 = int_to_ptr.hbm [resolvable:$true] %s15_s11 }
   0x3   :  { %s17_s13 = sshll.u32 %s168_s12, 4  ;;  %s26_s16 = sshll.u32 %s196_s1, 4  ;;  %s18_s13 = int_to_ptr.vmem [resolvable:$true] %s17_s13  ;;  %s27_s16 = int_to_ptr.hbm [resolvable:$true] %s26_s16 }
   0x4   :  { %20 = dma.hbm_to_vmem [thread:$0]  %s16_s11, 16, %s18_s13, [#allocation3]  }
   0x5   :  { %s169_s17 = smov [#allocation5]  }
   0x6   :  { %s28_s18 = sshll.u32 %s169_s17, 4  ;;  %s29_s18 = int_to_ptr.vmem [resolvable:$true] %s28_s18 }
   0x7   :  { %31 = dma.hbm_to_vmem [thread:$0]  %s27_s16, 16, %s29_s18, [#allocation6]  }
   0x8   :  { %162 = dma.done.wait [#allocation3], 16  }
   0x9   :  { %163 = vsyncadd [#allocation3], 4294967280 }
   0xa   :  { %164 = dma.done.wait [#allocation6], 16  }
   0xb   :  { %165 = vsyncadd [#allocation6], 4294967280  ;;  %v40_v0 = vld [vmem:[#allocation2] sm:$0x1]  ;;  %v41_v8 = vld [vmem:[#allocation5] sm:$0x1] }
   0xc   :  { %v42_v1 = vmul.f32 %v40_v0, %v40_v0  ;;  %v43_v12 = vmul.f32 0.5, %v41_v8  ;;  %vm63_vm4 = vcmask 8192   ;;  %s81_s19 = sshll.u32 %s197_s2, 4  ;;  %s170_s21 = smov [#allocation7]   ;;  %s82_s19 = int_to_ptr.hbm [resolvable:$true] %s81_s19 }
   0xe   :  { %98 = vrcp.f32 %v42_v1  ;;  %v59_v2 = vadd.f32 1.0, %v42_v1  ;;  %v55_v5 = vand.u32 2147483648, %v42_v1  ;;  %vm49_vm0 = vweird.f32 %v42_v1 }
   0xf   :  { %v53_v7 = vand.u32 2147483647, %v42_v1 }
  0x10   :  { %100 = vlog2.f32 %v59_v2  ;;  %v56_v11 = vor.u32 1.1754944e-38, %v55_v5 }
  0x11   :  { %vm54_vm3 = vcmp.eq.f32.partialorder %v53_v7, 8.507059e+37 }
  0x14   :  { %v99_v3 = vpop.eup %98 }
  0x15   :  { %v45_v4 = vmul.f32 %v99_v3, %v42_v1  ;;  %vm50_vm1 = vweird.f32 %v99_v3 }
  0x16   :  { %v101_v10 = vpop.eup %100  ;;  %vm51_vm2 = vmor %vm49_vm0, %vm50_vm1 }
  0x17   :  { %v46_v6 = vsub.f32 1.0, %v45_v4  ;;  %v61_v15 = vmul.f32 0.6931472, %v101_v10 }
  0x19   :  { %v47_v9 = vmul.f32 %v99_v3, %v46_v6 }
  0x1b   :  { %v48_v13 = vadd.f32 %v99_v3, %v47_v9 }
  0x1d   :  { %v52_v14 = vsel %vm51_vm2, %v99_v3, %v48_v13 }
  0x1e   :  { %v57_v16 = vsel %vm54_vm3, %v56_v11, %v52_v14 }
  0x1f   :  { %v58_v17 = vmul.f32 %v57_v16, %v43_v12 }
  0x21   :  { %v62_v18 = vadd.f32 %v61_v15, %v58_v17 }
  0x23   :  { %v64_v19 = vsel %vm63_vm4, %v62_v18, 0.0 }
  0x24   :  { %65 = vadd.xlane.f32.xlu0 %v64_v19 }
  0x97   :  { %v66_v20 = vpop.xlane.xlu0 %65 }
  0x98   :  { %v67_v21 = vrot.slane %v66_v20, 4 }
  0x9a   :  { %v68_v22 = vadd.f32 %v67_v21, %v66_v20 }
  0x9c   :  { %v69_v23 = vrot.slane %v68_v22, 2 }
  0x9e   :  { %v70_v24 = vadd.f32 %v69_v23, %v68_v22 }
  0xa0   :  { %v71_v25 = vrot.slane %v70_v24, 1 }
  0xa2   :  { %v72_v26 = vadd.f32 %v71_v25, %v70_v24 }
  0xa4   :  { %93 = vpush %v72_v26 }
  0xd5   :  { %s94_s20 = spop %93 }
  0xd6   :  { %75 = sst [smem:[#allocation7]] %s94_s20 }
  0xd7   :  { %84 = dma.smem_to_hbm %s170_s21, 16, %s82_s19, [#allocation4]  }
  0xd8   :  { %166 = dma.done.wait [#allocation4], 16  }
  0xd9   :  { %167 = vsyncadd [#allocation4], 4294967280 }
  0xda   :  { %89 = sfence }
  0xdb   :  { %90 = vsyncpa [#allocation3], 1 }
  0xdc   :  { %91 = vsyncpa [#allocation6], 1 }
  0xdd   :  { %92 = vsyncpa [#allocation4], 1 }

</bundles_post_ra>
